<compile_context>
chip_gen: v6e
topology: v6e:2x2x1
jax: 0.10.0
libtpu: 0.0.40
codegen_flags: <defaults>
</compile_context>

<pallas_src>
import functools
import math

import jax
import jax.numpy as jnp
from jax.experimental import pallas as pl
from jax.experimental.pallas import tpu as pltpu


def _make_pe(d_model: int, max_len: int) -> jnp.ndarray:
    """Replicates PositionalEncoding.__init__ exactly -> buffer (maxLen, 1, dModel)."""
    assert d_model % 2 == 0, "PositionalEncoding requires an even dModel"
    position = jnp.arange(0, max_len, dtype=jnp.float32)[:, None]                 # (maxLen, 1)
    denominator = jnp.exp(
        jnp.arange(0, d_model, 2, dtype=jnp.float32) * (math.log(10000.0) / d_model)
    )                                                                             # (d_model/2,)
    pe = jnp.zeros((max_len, d_model), dtype=jnp.float32)
    pe = pe.at[:, 0::2].set(jnp.sin(position / denominator))
    pe = pe.at[:, 1::2].set(jnp.cos(position / denominator))
    # unsqueeze(0).transpose(0, 1)  ->  (maxLen, 1, d_model)
    return pe[:, None, :]


def _add_pe_kernel_3d(x_ref, pe_ref, o_ref):
    # x_ref: (tt, B, D), pe_ref: (tt, 1, D).  Native sublane broadcast over B;
    # no materialized (tt, B, D) pe intermediate.
    o_ref[...] = (x_ref[...] + pe_ref[...]).astype(o_ref.dtype)


def _add_pe_kernel_folded(x_ref, pe_ref, o_ref, *, batch: int, d_model: int):
    # x_ref/o_ref: (tt, B*D), pe_ref: (tt, D).  Add pe to each D-wide lane chunk via a
    # static unrolled loop — no tile-sized jnp.tile intermediate, no spill traffic.
    pe = pe_ref[...]
    for b in range(batch):
        lo = b * d_model
        o_ref[:, lo:lo + d_model] = (x_ref[:, lo:lo + d_model] + pe).astype(o_ref.dtype)


def _choose_tile_t(seq_len: int, row_bytes: int, itemsize: int,
                   vmem_budget_bytes: int = 8 * 1024 * 1024,
                   min_steps: int = 8,
                   min_tile_bytes: int = 512 * 1024) -> int:
    """Pick the sequence tile.

    Live VMEM per step ~= 2 * (x tile) + 2 * (out tile) + 2 * (pe tile)
                       ~= 4 * tt * row_bytes   (pe tile is B-fold smaller).
    The 8 MiB default budget fits every generation's scoped default (v5e 16 MiB,
    v6e 32 MiB, v7x 32 MiB scoped / 64 MiB physical).  On v6e the budget can be
    raised to ~24-32 MiB for a few-% win (the wrapper then sets vmem_limit_bytes);
    on v5e/v7x keep it modest.

    For long sequences the tile is also capped so the grid has >= `min_steps`
    blocks (software pipelining + both v7x TensorCores), but never below
    `min_tile_bytes` so per-step overhead stays amortized.
    """
    sub = {1: 32, 2: 16}.get(itemsize, 8)           # dtype-aware sublane packing multiple
    rdown = lambda n: max(sub, (n // sub) * sub)

    budget_tt = rdown(vmem_budget_bytes // max(1, 4 * row_bytes))
    floor_tt = rdown(min_tile_bytes // max(1, row_bytes))
    steps_tt = rdown((seq_len + min_steps - 1) // min_steps)

    tt = min(budget_tt, max(floor_tt, steps_tt))
    if tt >= seq_len:
        return seq_len                              # one full-extent block (legal for any T)
    return tt


def positional_encoding_forward(x: jnp.ndarray, pe: jnp.ndarray, *,
                                tile_t: int | None = None,
                                vmem_budget_bytes: int = 8 * 1024 * 1024) -> jnp.ndarray:
    """x: (T, B, D); pe: (maxLen, 1, D).  Returns x + pe[:T] (broadcast over batch)."""
    T, B, D = x.shape
    itemsize = x.dtype.itemsize
    row_bytes = B * D * itemsize

    tt = tile_t if tile_t is not None else _choose_tile_t(
        T, row_bytes, itemsize, vmem_budget_bytes)
    tt = min(tt, T)
    grid = (pl.cdiv(T, tt),)

    cp_kwargs = dict(dimension_semantics=("parallel",))   # megacore sharding on v7x
    if vmem_budget_bytes > (16 << 20):
        # Budgets past v5e's 16 MiB scoped default need an explicit limit (with headroom
        # for Pallas-internal scratch).  Stay well under v7x's 64 MiB physical VMEM.
        cp_kwargs["vmem_limit_bytes"] = min(int(vmem_budget_bytes * 3 // 2), 100 << 20)
    compiler_params = pltpu.CompilerParams(**cp_kwargs)

    pe_t = pe[:T].astype(x.dtype)                          # (T, 1, D), cast once

    if D % 128 == 0:
        # 3-D path: lane-dense since D is a multiple of 128; pe broadcast over sublanes.
        return pl.pallas_call(
            _add_pe_kernel_3d,
            out_shape=jax.ShapeDtypeStruct((T, B, D), x.dtype),
            grid_spec=pl.GridSpec(
                grid=grid,
                in_specs=[
                    pl.BlockSpec((tt, B, D), lambda i: (i, 0, 0)),   # x tile
                    pl.BlockSpec((tt, 1, D), lambda i: (i, 0, 0)),   # pe tile (B-fold smaller)
                ],
                out_specs=pl.BlockSpec((tt, B, D), lambda i: (i, 0, 0)),
            ),
            compiler_params=compiler_params,
            input_output_aliases={0: 0},
        )(x, pe_t)

    # Folded path (small / unaligned D): merge (B, D) -> B*D so the output's trailing
    # dim is as lane-dense as possible; per-chunk add avoids any tile-sized temporary.
    x2 = x.reshape(T, B * D)                               # zero-cost trailing-dim merge
    pe2 = pe_t[:, 0, :]                                    # (T, D)
    out2 = pl.pallas_call(
        functools.partial(_add_pe_kernel_folded, batch=B, d_model=D),
        out_shape=jax.ShapeDtypeStruct((T, B * D), x.dtype),
        grid_spec=pl.GridSpec(
            grid=grid,
            in_specs=[
                pl.BlockSpec((tt, B * D), lambda i: (i, 0)),         # x tile (lane-dense)
                pl.BlockSpec((tt, D), lambda i: (i, 0)),             # pe tile
            ],
            out_specs=pl.BlockSpec((tt, B * D), lambda i: (i, 0)),
        ),
        compiler_params=compiler_params,
        input_output_aliases={0: 0},
    )(x2, pe2)
    return out2.reshape(T, B, D)


if __name__ == "__main__":
    # --- Primary test: module config / shapes implied by the PyTorch forward ---
    d_model, max_len = 32, 16
    T, B = 8, 2
    key = jax.random.PRNGKey(0)
    x = jax.random.normal(key, (T, B, d_model), dtype=jnp.float32)
    pe = _make_pe(d_model, max_len)

    ref = x + pe[:T, :, :]                                  # reference computed first
    out = jax.block_until_ready(positional_encoding_forward(x, pe))
    assert out.shape == (T, B, d_model)
    assert jnp.allclose(out, ref, atol=1e-6), "mismatch vs reference (folded path)"

    # --- Secondary: lane-aligned D exercises the 3-D sublane-broadcast path ---
    d2, ml2, T2, B2 = 128, 32, 16, 8
    x2 = jax.random.normal(jax.random.PRNGKey(1), (T2, B2, d2), dtype=jnp.float32)
    pe2 = _make_pe(d2, ml2)
    ref2 = x2 + pe2[:T2, :, :]
    out2 = jax.block_until_ready(positional_encoding_forward(x2, pe2))
    assert jnp.allclose(out2, ref2, atol=1e-6), "mismatch vs reference (3-D path)"

    # --- Tertiary: multi-step grid with a non-divisible tail (masked tail writes) ---
    T3 = 20
    x3 = jax.random.normal(jax.random.PRNGKey(2), (T3, B, d_model), dtype=jnp.float32)
    pe3 = _make_pe(d_model, 32)
    ref3 = x3 + pe3[:T3, :, :]
    out3 = jax.block_until_ready(positional_encoding_forward(x3, pe3, tile_t=8))
    assert jnp.allclose(out3, ref3, atol=1e-6), "mismatch vs reference (tail block)"

    print("KERNEL_OK")
</pallas_src>

<mosaic_0001>
module attributes {stable_mosaic.version = 11 : i64} {
  func.func @_add_pe_kernel_folded(%arg0: i32, %arg1: memref<8x64xf32, #tpu.memory_space<vmem>>, %arg2: memref<8x32xf32, #tpu.memory_space<vmem>>, %arg3: memref<8x64xf32, #tpu.memory_space<vmem>>) attributes {dimension_semantics = [#tpu.dimension_semantics<parallel>], iteration_bounds = array<i64: 1>, scalar_prefetch = 0 : i64, scratch_operands = 0 : i64, tpu.core_type = #tpu.core_type<tc>, window_params = [{transform_indices = @transform_0, window_bounds = array<i64: 8, 64>}, {transform_indices = @transform_1, window_bounds = array<i64: 8, 32>}, {transform_indices = @transform_2, window_bounds = array<i64: 8, 64>}]} {
    %c0 = arith.constant 0 : index
    %c0_0 = arith.constant 0 : index
    %0 = vector.load %arg2[%c0, %c0_0] : memref<8x32xf32, #tpu.memory_space<vmem>>, vector<8x32xf32>
    %c0_1 = arith.constant 0 : index
    %c0_2 = arith.constant 0 : index
    %1 = vector.load %arg1[%c0_1, %c0_2] : memref<8x64xf32, #tpu.memory_space<vmem>>, vector<8x32xf32>
    %2 = arith.addf %1, %0 : vector<8x32xf32>
    %c0_3 = arith.constant 0 : index
    %c0_4 = arith.constant 0 : index
    %3 = vector.load %arg3[%c0_3, %c0_4] : memref<8x64xf32, #tpu.memory_space<vmem>>, vector<8x32xf32>
    tpu.vector_store %arg3[%c0_3, %c0_4], %2 {strides = array<i32>} : memref<8x64xf32, #tpu.memory_space<vmem>>, vector<8x32xf32>,
    %c0_5 = arith.constant 0 : index
    %c32 = arith.constant 32 : index
    %4 = vector.load %arg1[%c0_5, %c32] : memref<8x64xf32, #tpu.memory_space<vmem>>, vector<8x32xf32>
    %5 = arith.addf %4, %0 : vector<8x32xf32>
    %c0_6 = arith.constant 0 : index
    %c32_7 = arith.constant 32 : index
    %6 = vector.load %arg3[%c0_6, %c32_7] : memref<8x64xf32, #tpu.memory_space<vmem>>, vector<8x32xf32>
    tpu.vector_store %arg3[%c0_6, %c32_7], %5 {strides = array<i32>} : memref<8x64xf32, #tpu.memory_space<vmem>>, vector<8x32xf32>,
    return
  }
  func.func @transform_0(%arg0: i32) -> (i32, i32) {
    %c0_i32 = arith.constant 0 : i32
    %c0_i32_0 = arith.constant 0 : i32
    return %arg0, %c0_i32 : i32, i32
  }
  func.func @transform_1(%arg0: i32) -> (i32, i32) {
    %c0_i32 = arith.constant 0 : i32
    %c0_i32_0 = arith.constant 0 : i32
    return %arg0, %c0_i32 : i32, i32
  }
  func.func @transform_2(%arg0: i32) -> (i32, i32) {
    %c0_i32 = arith.constant 0 : i32
    %c0_i32_0 = arith.constant 0 : i32
    return %arg0, %c0_i32 : i32, i32
  }
}

</mosaic_0001>

<bundles_post_ra>
// kernel: tpu_custom_call.1
= control target key start
LH: loop header
LB: loop body
LE: loop exit
PB: predicated region body
PF: predicated region fallthrough
CT: control target
= control target key end

     0   :  { %7 = vsyncpa [#allocation3], 0  ;;  %s126_s0 = inlined_call_operand.hbm [shape: f32[8,64], index: 0, kind: input, shape index: {}, may-alias: {0,2}]   ;;  %s127_s1 = inlined_call_operand.vmem [shape: f32[8,32], index: 1, kind: input, shape index: {}]   ;;  %s128_s2 = inlined_call_operand.hbm [shape: f32[8,64], index: 2, kind: output, shape index: {}, may-alias: {0,2}]  }
   0x1   :  { %8 = vsyncpa [#allocation4], 0  ;;  %s99_s9 = smov [#allocation2]  }
   0x2   :  { %s15_s10 = sshll.u32 %s99_s9, 4  ;;  %s16_s10 = int_to_ptr.vmem [resolvable:$true] %s15_s10 }
   0x3   :  { %s63_s11 = scalar_lea.vmem %s16_s10, 128  ;;  %p68_p1 = scmp.lt.s32.totalorder %s16_s10, %s16_s10 }
   0x4   :  { %p64_p0 = scmp.ne.s32.totalorder %s16_s10, %s63_s11  ;;  %p69_p2 = scmp.lt.s32.totalorder %s63_s11, %s63_s11 }
   0x6   :  { %p70_p3 = por %p69_p2, %p68_p1 }
   0x8   :  { %p71_p4 = pnand %p70_p3, %p64_p0 }
   0xa   :  { %74 = shalt.err (!%p71_p4)
}
   0xb   :  { %18 = dma.hbm_to_vmem [thread:$0]  %s126_s0, 128, %s16_s10, [#allocation3]  }
   0xc   :  { %95 = dma.done.wait [#allocation3], 128  }
   0xd   :  { %96 = vsyncadd [#allocation3], 4294967168  ;;  %v24_v0 = vld [vmem:[%s127_s1] sm:$0xff]  ;;  %vm27_vm0 = vcmask 261120   ;;  %s100_s16 = smov 32   ;;  %s101_s17 = smov [#allocation5]  }
   0xe   :  { %v25_v1 = vld [vmem:[#allocation2] sm:$0xff]  ;;  %31 = vrot.lane.b32.xlu0 %v24_v0, %s100_s16  ;;  %s43_s18 = sshll.u32 %s101_s17, 4  ;;  %vm35_vm1 = vcmask 523520   ;;  %s44_s18 = int_to_ptr.vmem [resolvable:$true] %s43_s18 }
   0xf   :  { %v26_v2 = vadd.f32 %v25_v1, %v24_v0  ;;  %s75_s0 = scalar_lea.vmem %s44_s18, 128  ;;  %p80_p6 = scmp.lt.s32.totalorder %s44_s18, %s44_s18 }
  0x10   :  { %p76_p5 = scmp.ne.s32.totalorder %s44_s18, %s75_s0  ;;  %p81_p7 = scmp.lt.s32.totalorder %s75_s0, %s75_s0 }
  0x11   :  { %28 = vst.msk [vmem:[#allocation5] sm:$0xff] %vm27_vm0, %v26_v2 }
  0x12   :  { %p82_p8 = por %p81_p7, %p80_p6 }
  0x14   :  { %p83_p9 = pnand %p82_p8, %p76_p5 }
  0x80   :  { %v32_v3 = vpop.permute.xlu0 %31 }
  0x81   :  { %v34_v4 = vadd.f32 %v32_v3, %v25_v1 }
  0x83   :  { %36 = vst.msk [vmem:[#allocation5] sm:$0xff] %vm35_vm1, %v34_v4 }
  0x84   :  { %86 = shalt.err (!%p83_p9)
}
  0x85   :  { %46 = dma.vmem_to_hbm [thread:$0]  %s44_s18, 128, %s128_s2, [#allocation4]  }
  0x86   :  { %97 = dma.done.wait [#allocation4], 128  }
  0x87   :  { %98 = vsyncadd [#allocation4], 4294967168 }
  0x88   :  { %50 = vsyncpa [#allocation3], 1 }
  0x89   :  { %51 = vsyncpa [#allocation4], 1 }

</bundles_post_ra>
